<compile_context>
chip_gen: v7x
topology: tpu7x:2x2x1
jax: 0.10.0
libtpu: 0.0.40
codegen_flags: <defaults>
</compile_context>

<pallas_src>
import math

import jax
import jax.numpy as jnp
from jax import lax
from jax.experimental import pallas as pl
from jax.experimental.pallas import tpu as pltpu


def _round_up(v, m):
    return ((v + m - 1) // m) * m


def _tv_pool_kernel(k, n_pad, tn, matmul_dtype, elementwise_dtype):
    """Per-(graph, row-chunk) body: accumulate s^T A s, the TV numerator and the edge
    count into resident output blocks (same block index across the chunk axis)."""

    def kernel(s_ref, st_ref, adj_ref, ap_ref, tv_ref, ne_ref):
        t = pl.program_id(1)

        @pl.when(t == 0)
        def _init():
            ap_ref[...] = jnp.zeros_like(ap_ref)
            tv_ref[...] = jnp.zeros_like(tv_ref)
            ne_ref[...] = jnp.zeros_like(ne_ref)

        adj_c = adj_ref[0]                                   # (TN, N)
        s_full = s_ref[0]                                    # (N, K)
        r0 = pl.multiple_of(t * tn, tn)
        s_chunk = s_ref[0, pl.ds(r0, tn), :]                 # (TN, K)

        # ---- pooled adjacency:  s^T A s  ==  sum_chunks  s_chunk^T (A_chunk @ s) -------
        as_c = jnp.dot(adj_c.astype(matmul_dtype), s_full.astype(matmul_dtype),
                       preferred_element_type=jnp.float32)                   # (TN, K)
        ap_ref[0] += lax.dot_general(s_chunk, as_c, (((0,), (0,)), ((), ())),
                                     preferred_element_type=jnp.float32)     # (K, K)

        # ---- TV numerator: per-cluster lane-dense (TN, N) |s_i - s_j| pass -------------
        # K is tiny & static; with the rank/quantile work hoisted to XLA the per-cluster
        # body is a single sub/abs/add, so the unrolled live set stays small.
        s_ce = s_chunk.astype(elementwise_dtype)
        st_e = st_ref[0].astype(elementwise_dtype)           # (K, N)
        adj_e = adj_c.astype(elementwise_dtype)
        l1 = jnp.abs(s_ce[:, 0:1] - st_e[0:1, :])
        for c in range(1, k):
            l1 = l1 + jnp.abs(s_ce[:, c:c + 1] - st_e[c:c + 1, :])

        # Lane-dense partial accumulators: one sublane reduce per chunk; the final
        # cross-lane reduce happens once in XLA (saves XLU passes per chunk).
        tv_ref[0] += jnp.sum((adj_e * l1).astype(jnp.float32), axis=0, keepdims=True)
        # TODO(synk): if the adjacency is known binary, the nonzero test below can be
        # replaced by a reused row-sum of adj_c.
        ne_ref[0] += jnp.sum((adj_c != 0.0).astype(jnp.float32), axis=0, keepdims=True)

    return kernel


def _choose_row_block(n, target):
    """Row-chunk height: multiple of 8 (f32 sublane tiling), <= target, <= padded n."""
    tn = max(8, min(target, _round_up(n, 8)))
    return (tn // 8) * 8


def _vmem_limit_bytes(n_pad, k, tn):
    f32 = 4
    k_lanes = _round_up(k, 128)
    k_subs = _round_up(k, 8)
    est = f32 * (
        2 * tn * n_pad                 # adj row chunk, double-buffered
        + 2 * n_pad * k_lanes          # s (N, K) resident block (lane-padded)
        + 2 * k_subs * n_pad           # s^T (K, N) resident block
        + 2 * k_subs * k_lanes         # adj_pool resident output
        + 2 * 2 * 8 * n_pad            # TV / edge-count partial outputs
        + 4 * tn * n_pad               # elementwise temporaries (l1 / diff / product)
    )
    try:
        info = pltpu.get_tpu_info()
        physical = int(getattr(info, "vmem_capacity_bytes", 64 * 1024 * 1024))
    except Exception:
        physical = 64 * 1024 * 1024    # v7x-conservative fallback
    return int(min(max(2 * est, 32 * 1024 * 1024), int(0.85 * physical)))


def asym_cheeger_cut_pool(x, adj, w1, b1, w2, b2, k,
                          totvar_coeff=1.0, balance_coeff=1.0,
                          row_block=256,
                          matmul_dtype=jnp.float32,
                          elementwise_dtype=jnp.float32):
    """Forward of AsymCheegerCutPool (mask=None, return_selection=False,
    return_pooled_graph=True): returns (x_pool, adj_pool, tv_loss, bal_loss).

    row_block: adjacency row-chunk height streamed by the Pallas kernel.  256 is a safe
        default under v7x's 64 MiB VMEM; 512 amortizes per-step overhead better on v5e/v6e.
    matmul_dtype: jnp.bfloat16 halves/thirds MXU passes on v5e/v7x (small accuracy cost).
    elementwise_dtype: jnp.bfloat16 ~2x the l1-pass VPU throughput on v6e/v7x
        (do NOT use on v5e: no bf16 VPU path).
    """
    B, N, F = x.shape

    # ---- O(N*K)/O(N*F) work: MLP -> softmax -> s, pooled features, balance loss (XLA) ---
    h = jnp.maximum(jnp.einsum('bnf,fh->bnh', x, w1) + b1, 0.0)
    logits = jnp.einsum('bnh,hk->bnk', h, w2) + b2
    s = jax.nn.softmax(logits, axis=-1)                               # (B, N, K)
    x_pool = jnp.einsum('bnk,bnf->bkf', s, x)                         # (B, K, F)

    idx = int(math.floor(N / k))
    quant = jnp.sort(s, axis=-2)[:, N - 1 - idx, :]                   # descending[idx]
    d = s - quant[:, None, :]
    bal = jnp.where(d >= 0.0, (k - 1.0) * d, -d)
    bal = (N * (k - 1) - jnp.sum(bal, axis=(-1, -2))) / float(N * (k - 1))
    bal_loss = balance_coeff * jnp.mean(bal)

    # ---- O(N^2) adjacency work: Pallas kernel over streamed lane-dense row chunks -------
    tn = _choose_row_block(N, row_block)
    n_pad = _round_up(max(N, tn), tn)
    n_chunks = n_pad // tn
    if n_pad != N:
        # Zero adjacency rows/cols and zero assignment rows leave s^T A s, the TV
        # numerator and the edge count unchanged.
        adj_p = jnp.pad(adj, ((0, 0), (0, n_pad - N), (0, n_pad - N)))
        s_p = jnp.pad(s, ((0, 0), (0, n_pad - N), (0, 0)))
    else:
        adj_p, s_p = adj, s
    st_p = jnp.swapaxes(s_p, 1, 2)                                    # (B, K, N_pad)

    kernel = _tv_pool_kernel(k, n_pad, tn, matmul_dtype, elementwise_dtype)

    grid_spec = pltpu.PrefetchScalarGridSpec(
        num_scalar_prefetch=0,
        grid=(B, n_chunks),
        in_specs=[
            pl.BlockSpec((1, n_pad, k), lambda b, t: (b, 0, 0)),   # s   (resident per graph)
            pl.BlockSpec((1, k, n_pad), lambda b, t: (b, 0, 0)),   # s^T (resident per graph)
            # TODO(synk): on v5e, pipeline_mode=pl.Buffered(3) on the adj spec hides the
            # chunk DMA once per-chunk compute shrinks; omitted to keep v7x VMEM headroom.
            pl.BlockSpec((1, tn, n_pad), lambda b, t: (b, t, 0)),  # adj row chunks (stream)
        ],
        out_specs=[
            pl.BlockSpec((1, k, k), lambda b, t: (b, 0, 0)),       # adj_pool  (accumulator)
            pl.BlockSpec((1, 1, n_pad), lambda b, t: (b, 0, 0)),   # TV numerator partials
            pl.BlockSpec((1, 1, n_pad), lambda b, t: (b, 0, 0)),   # edge-count partials
        ],
    )

    adj_pool, tv_part, ne_part = pl.pallas_call(
        kernel,
        out_shape=(
            jax.ShapeDtypeStruct((B, k, k), jnp.float32),
            jax.ShapeDtypeStruct((B, 1, n_pad), jnp.float32),
            jax.ShapeDtypeStruct((B, 1, n_pad), jnp.float32),
        ),
        grid_spec=grid_spec,
        compiler_params=pltpu.CompilerParams(
            # TODO(synk): for B == 1 on v7x, additionally split the chunk axis across the
            # two TensorCores (two partial accumulators combined afterwards).
            dimension_semantics=("parallel", "arbitrary"),
            vmem_limit_bytes=_vmem_limit_bytes(n_pad, k, tn),
        ),
    )(s_p, st_p, adj_p)

    tv_num = jnp.sum(tv_part[:, 0, :], axis=-1)                       # (B,)
    n_edges = jnp.sum(ne_part[:, 0, :], axis=-1)                      # (B,)
    # NOTE: matches torch semantics — no guard against n_edges == 0 (inf/nan propagate).
    tv_loss = totvar_coeff * jnp.mean(tv_num / (2.0 * n_edges))

    return x_pool, adj_pool, tv_loss, bal_loss


def reference(x, adj, w1, b1, w2, b2, k, totvar_coeff=1.0, balance_coeff=1.0):
    """Pure-JAX reference mirroring the PyTorch forward (mask=None)."""
    h = jnp.maximum(jnp.einsum('bnf,fh->bnh', x, w1) + b1, 0.0)
    logits = jnp.einsum('bnh,hk->bnk', h, w2) + b2
    s = jax.nn.softmax(logits, axis=-1)
    x_pool = jnp.einsum('bnk,bnf->bkf', s, x)
    adj_pool = jnp.einsum('bkn,bnm,bml->bkl', jnp.swapaxes(s, 1, 2), adj, s)

    l1 = jnp.sum(jnp.abs(s[:, :, None, :] - s[:, None, :, :]), axis=-1)
    n_edges = jnp.count_nonzero(adj, axis=(-1, -2)).astype(jnp.float32)
    tv = jnp.sum(adj * l1, axis=(-1, -2)) / (2.0 * n_edges)

    N = s.shape[1]
    idx = int(math.floor(N / k))
    quant = jnp.sort(s, axis=-2)[:, N - 1 - idx, :]
    d = s - quant[:, None, :]
    loss = jnp.where(d >= 0.0, (k - 1.0) * d, -d)
    loss = jnp.sum(loss, axis=(-1, -2))
    bal = (N * (k - 1) - loss) / (N * (k - 1))

    return (x_pool, adj_pool,
            totvar_coeff * jnp.mean(tv),
            balance_coeff * jnp.mean(bal))


def xavier_uniform(key, fan_in, fan_out):
    bound = math.sqrt(6.0 / (fan_in + fan_out))
    return jax.random.uniform(key, (fan_in, fan_out),
                              minval=-bound, maxval=bound, dtype=jnp.float32)


if __name__ == "__main__":
    B, F, H, K = 2, 8, 32, 4   # batch, features, mlp hidden, clusters

    key = jax.random.PRNGKey(0)
    k1, k2, kd = jax.random.split(key, 3)

    # MLP params: Linear(F, H) + ReLU + Linear(H, K); xavier-uniform weights, zero bias.
    w1 = xavier_uniform(k1, F, H)
    b1 = jnp.zeros((1, H), dtype=jnp.float32)
    w2 = xavier_uniform(k2, H, K)
    b2 = jnp.zeros((1, K), dtype=jnp.float32)

    names = ("x_pool", "adj_pool", "tv_loss", "bal_loss")
    # N=16 exercises the aligned path (1-chunk and 2-chunk); N=12 exercises zero-padding.
    for N in (16, 12):
        kx, ka, kd = jax.random.split(kd, 3)
        x = jax.random.normal(kx, (B, N, F), dtype=jnp.float32)

        # Symmetric binary adjacency with zero diagonal.
        a = (jax.random.uniform(ka, (B, N, N)) > 0.5).astype(jnp.float32)
        adj = jnp.clip(a + jnp.swapaxes(a, 1, 2), 0.0, 1.0)
        adj = adj * (1.0 - jnp.eye(N, dtype=jnp.float32)[None])

        ref = reference(x, adj, w1, b1, w2, b2, K)
        for rb in (256, 8):
            outs = jax.block_until_ready(
                asym_cheeger_cut_pool(x, adj, w1, b1, w2, b2, K, row_block=rb))
            for name, o, r in zip(names, outs, ref):
                assert jnp.allclose(o, r, rtol=2e-4, atol=1e-5), (
                    f"mismatch in {name} (N={N}, row_block={rb})")

    # TODO(synk): the optional `mask` argument (ragged graphs) is not implemented;
    # only the mask=None path of the PyTorch module is covered.
    print("KERNEL_OK")
</pallas_src>

<mosaic_0001>
module attributes {stable_mosaic.version = 11 : i64} {
  func.func @kernel(%arg0: i32, %arg1: i32, %arg2: memref<1x16x4xf32, #tpu.memory_space<vmem>>, %arg3: memref<1x4x16xf32, #tpu.memory_space<vmem>>, %arg4: memref<1x16x16xf32, #tpu.memory_space<vmem>>, %arg5: memref<1x4x4xf32, #tpu.memory_space<vmem>>, %arg6: memref<1x1x16xf32, #tpu.memory_space<vmem>>, %arg7: memref<1x1x16xf32, #tpu.memory_space<vmem>>) attributes {dimension_semantics = [#tpu.dimension_semantics<parallel>, #tpu.dimension_semantics<arbitrary>], iteration_bounds = array<i64: 2, 1>, scalar_prefetch = 0 : i64, scratch_operands = 0 : i64, tpu.core_type = #tpu.core_type<tc>, window_params = [{transform_indices = @transform_0, window_bounds = array<i64: 1, 16, 4>}, {transform_indices = @transform_1, window_bounds = array<i64: 1, 4, 16>}, {transform_indices = @transform_2, window_bounds = array<i64: 1, 16, 16>}, {transform_indices = @transform_3, window_bounds = array<i64: 1, 4, 4>}, {transform_indices = @transform_4, window_bounds = array<i64: 1, 1, 16>}, {transform_indices = @transform_5, window_bounds = array<i64: 1, 1, 16>}]} {
    %c0_i32 = arith.constant 0 : i32
    %0 = arith.cmpi eq, %arg1, %c0_i32 : i32
    %1 = arith.extui %0 : i1 to i32
    %c0_i32_0 = arith.constant 0 : i32
    %2 = arith.cmpi ne, %1, %c0_i32_0 : i32
    scf.if %2 {
      %cst_33 = arith.constant 0.000000e+00 : f32
      %70 = vector.broadcast %cst_33 : f32 to vector<1x4x4xf32>
      %c0_34 = arith.constant 0 : index
      %c0_35 = arith.constant 0 : index
      %c0_36 = arith.constant 0 : index
      %71 = vector.load %arg5[%c0_34, %c0_35, %c0_36] : memref<1x4x4xf32, #tpu.memory_space<vmem>>, vector<1x4x4xf32>
      tpu.vector_store %arg5[%c0_34, %c0_35, %c0_36], %70 {strides = array<i32>} : memref<1x4x4xf32, #tpu.memory_space<vmem>>, vector<1x4x4xf32>,
      %cst_37 = arith.constant 0.000000e+00 : f32
      %72 = vector.broadcast %cst_37 : f32 to vector<1x1x16xf32>
      %c0_38 = arith.constant 0 : index
      %c0_39 = arith.constant 0 : index
      %c0_40 = arith.constant 0 : index
      %73 = vector.load %arg6[%c0_38, %c0_39, %c0_40] : memref<1x1x16xf32, #tpu.memory_space<vmem>>, vector<1x1x16xf32>
      tpu.vector_store %arg6[%c0_38, %c0_39, %c0_40], %72 {strides = array<i32>} : memref<1x1x16xf32, #tpu.memory_space<vmem>>, vector<1x1x16xf32>,
      %cst_41 = arith.constant 0.000000e+00 : f32
      %74 = vector.broadcast %cst_41 : f32 to vector<1x1x16xf32>
      %c0_42 = arith.constant 0 : index
      %c0_43 = arith.constant 0 : index
      %c0_44 = arith.constant 0 : index
      %75 = vector.load %arg7[%c0_42, %c0_43, %c0_44] : memref<1x1x16xf32, #tpu.memory_space<vmem>>, vector<1x1x16xf32>
      tpu.vector_store %arg7[%c0_42, %c0_43, %c0_44], %74 {strides = array<i32>} : memref<1x1x16xf32, #tpu.memory_space<vmem>>, vector<1x1x16xf32>,
    } else {
    }
    %c0 = arith.constant 0 : index
    %c0_1 = arith.constant 0 : index
    %c0_2 = arith.constant 0 : index
    %3 = vector.load %arg4[%c0, %c0_1, %c0_2] : memref<1x16x16xf32, #tpu.memory_space<vmem>>, vector<1x16x16xf32>
    %4 = vector.shape_cast %3 : vector<1x16x16xf32> to vector<16x16xf32>
    %c0_3 = arith.constant 0 : index
    %c0_4 = arith.constant 0 : index
    %c0_5 = arith.constant 0 : index
    %5 = vector.load %arg2[%c0_3, %c0_4, %c0_5] : memref<1x16x4xf32, #tpu.memory_space<vmem>>, vector<1x16x4xf32>
    %6 = vector.shape_cast %5 : vector<1x16x4xf32> to vector<16x4xf32>
    %c16_i32 = arith.constant 16 : i32
    %7 = arith.muli %arg1, %c16_i32 : i32
    %8 = tpu.assume_multiple %7, 16 : i32
    %c0_6 = arith.constant 0 : index
    %9 = arith.index_cast %8 : i32 to index
    %c0_7 = arith.constant 0 : index
    %10 = vector.load %arg2[%c0_6, %9, %c0_7] : memref<1x16x4xf32, #tpu.memory_space<vmem>>, vector<1x16x4xf32>
    %11 = vector.shape_cast %10 : vector<1x16x4xf32> to vector<16x4xf32>
    %cst = arith.constant dense<0.000000e+00> : vector<16x4xf32>
    %12 = tpu.matmul %4, %6, %cst {dimension_numbers = #tpu.dot_dimension_numbers<[1], [0], [0], [1], [0, 0, 1, 1], [], []>} : vector<16x16xf32>, vector<16x4xf32>, vector<16x4xf32> -> vector<16x4xf32>
    %c0_8 = arith.constant 0 : index
    %c0_9 = arith.constant 0 : index
    %c0_10 = arith.constant 0 : index
    %13 = vector.load %arg5[%c0_8, %c0_9, %c0_10] : memref<1x4x4xf32, #tpu.memory_space<vmem>>, vector<1x4x4xf32>
    %14 = vector.shape_cast %13 : vector<1x4x4xf32> to vector<4x4xf32>
    %cst_11 = arith.constant dense<0.000000e+00> : vector<4x4xf32>
    %15 = tpu.matmul %11, %12, %cst_11 {dimension_numbers = #tpu.dot_dimension_numbers<[0], [0], [1], [1], [0, 1, 1, 1], [], []>} : vector<16x4xf32>, vector<16x4xf32>, vector<4x4xf32> -> vector<4x4xf32>
    %16 = arith.addf %14, %15 : vector<4x4xf32>
    %c0_12 = arith.constant 0 : index
    %c0_13 = arith.constant 0 : index
    %c0_14 = arith.constant 0 : index
    %17 = vector.load %arg5[%c0_12, %c0_13, %c0_14] : memref<1x4x4xf32, #tpu.memory_space<vmem>>, vector<1x4x4xf32>
    %18 = vector.shape_cast %17 : vector<1x4x4xf32> to vector<4x4xf32>
    %19 = vector.shape_cast %16 : vector<4x4xf32> to vector<1x4x4xf32>
    tpu.vector_store %arg5[%c0_12, %c0_13, %c0_14], %19 {strides = array<i32>} : memref<1x4x4xf32, #tpu.memory_space<vmem>>, vector<1x4x4xf32>,
    %c0_15 = arith.constant 0 : index
    %c0_16 = arith.constant 0 : index
    %c0_17 = arith.constant 0 : index
    %20 = vector.load %arg3[%c0_15, %c0_16, %c0_17] : memref<1x4x16xf32, #tpu.memory_space<vmem>>, vector<1x4x16xf32>
    %21 = vector.shape_cast %20 : vector<1x4x16xf32> to vector<4x16xf32>
    %22 = vector.extract_strided_slice %11 {offsets = [0, 0], sizes = [16, 1], strides = [1, 1]} : vector<16x4xf32> to vector<16x1xf32>
    %23 = vector.extract_strided_slice %21 {offsets = [0, 0], sizes = [1, 16], strides = [1, 1]} : vector<4x16xf32> to vector<1x16xf32>
    %24 = vector.broadcast %22 : vector<16x1xf32> to vector<16x16xf32>
    %25 = vector.broadcast %23 : vector<1x16xf32> to vector<16x16xf32>
    %26 = arith.subf %24, %25 : vector<16x16xf32>
    %27 = math.absf %26 : vector<16x16xf32>
    %28 = vector.extract_strided_slice %11 {offsets = [0, 1], sizes = [16, 1], strides = [1, 1]} : vector<16x4xf32> to vector<16x1xf32>
    %29 = vector.extract_strided_slice %21 {offsets = [1, 0], sizes = [1, 16], strides = [1, 1]} : vector<4x16xf32> to vector<1x16xf32>
    %30 = vector.broadcast %28 : vector<16x1xf32> to vector<16x16xf32>
    %31 = vector.broadcast %29 : vector<1x16xf32> to vector<16x16xf32>
    %32 = arith.subf %30, %31 : vector<16x16xf32>
    %33 = math.absf %32 : vector<16x16xf32>
    %34 = arith.addf %27, %33 : vector<16x16xf32>
    %35 = vector.extract_strided_slice %11 {offsets = [0, 2], sizes = [16, 1], strides = [1, 1]} : vector<16x4xf32> to vector<16x1xf32>
    %36 = vector.extract_strided_slice %21 {offsets = [2, 0], sizes = [1, 16], strides = [1, 1]} : vector<4x16xf32> to vector<1x16xf32>
    %37 = vector.broadcast %35 : vector<16x1xf32> to vector<16x16xf32>
    %38 = vector.broadcast %36 : vector<1x16xf32> to vector<16x16xf32>
    %39 = arith.subf %37, %38 : vector<16x16xf32>
    %40 = math.absf %39 : vector<16x16xf32>
    %41 = arith.addf %34, %40 : vector<16x16xf32>
    %42 = vector.extract_strided_slice %11 {offsets = [0, 3], sizes = [16, 1], strides = [1, 1]} : vector<16x4xf32> to vector<16x1xf32>
    %43 = vector.extract_strided_slice %21 {offsets = [3, 0], sizes = [1, 16], strides = [1, 1]} : vector<4x16xf32> to vector<1x16xf32>
    %44 = vector.broadcast %42 : vector<16x1xf32> to vector<16x16xf32>
    %45 = vector.broadcast %43 : vector<1x16xf32> to vector<16x16xf32>
    %46 = arith.subf %44, %45 : vector<16x16xf32>
    %47 = math.absf %46 : vector<16x16xf32>
    %48 = arith.addf %41, %47 : vector<16x16xf32>
    %c0_18 = arith.constant 0 : index
    %c0_19 = arith.constant 0 : index
    %c0_20 = arith.constant 0 : index
    %49 = vector.load %arg6[%c0_18, %c0_19, %c0_20] : memref<1x1x16xf32, #tpu.memory_space<vmem>>, vector<1x1x16xf32>
    %50 = vector.shape_cast %49 : vector<1x1x16xf32> to vector<1x16xf32>
    %51 = arith.mulf %4, %48 : vector<16x16xf32>
    %cst_21 = arith.constant dense<0.000000e+00> : vector<16xf32>
    %52 = vector.multi_reduction <add>, %51, %cst_21 [0] : vector<16x16xf32> to vector<16xf32>
    %53 = vector.shape_cast %52 : vector<16xf32> to vector<1x16xf32>
    %54 = arith.addf %50, %53 : vector<1x16xf32>
    %c0_22 = arith.constant 0 : index
    %c0_23 = arith.constant 0 : index
    %c0_24 = arith.constant 0 : index
    %55 = vector.load %arg6[%c0_22, %c0_23, %c0_24] : memref<1x1x16xf32, #tpu.memory_space<vmem>>, vector<1x1x16xf32>
    %56 = vector.shape_cast %55 : vector<1x1x16xf32> to vector<1x16xf32>
    %57 = vector.shape_cast %54 : vector<1x16xf32> to vector<1x1x16xf32>
    tpu.vector_store %arg6[%c0_22, %c0_23, %c0_24], %57 {strides = array<i32>} : memref<1x1x16xf32, #tpu.memory_space<vmem>>, vector<1x1x16xf32>,
    %c0_25 = arith.constant 0 : index
    %c0_26 = arith.constant 0 : index
    %c0_27 = arith.constant 0 : index
    %58 = vector.load %arg7[%c0_25, %c0_26, %c0_27] : memref<1x1x16xf32, #tpu.memory_space<vmem>>, vector<1x1x16xf32>
    %59 = vector.shape_cast %58 : vector<1x1x16xf32> to vector<1x16xf32>
    %cst_28 = arith.constant 0.000000e+00 : f32
    %60 = vector.broadcast %cst_28 : f32 to vector<16x16xf32>
    %61 = arith.cmpf one, %4, %60 : vector<16x16xf32>
    %62 = arith.extui %61 : vector<16x16xi1> to vector<16x16xi32>
    %63 = arith.sitofp %62 : vector<16x16xi32> to vector<16x16xf32>
    %cst_29 = arith.constant dense<0.000000e+00> : vector<16xf32>
    %64 = vector.multi_reduction <add>, %63, %cst_29 [0] : vector<16x16xf32> to vector<16xf32>
    %65 = vector.shape_cast %64 : vector<16xf32> to vector<1x16xf32>
    %66 = arith.addf %59, %65 : vector<1x16xf32>
    %c0_30 = arith.constant 0 : index
    %c0_31 = arith.constant 0 : index
    %c0_32 = arith.constant 0 : index
    %67 = vector.load %arg7[%c0_30, %c0_31, %c0_32] : memref<1x1x16xf32, #tpu.memory_space<vmem>>, vector<1x1x16xf32>
    %68 = vector.shape_cast %67 : vector<1x1x16xf32> to vector<1x16xf32>
    %69 = vector.shape_cast %66 : vector<1x16xf32> to vector<1x1x16xf32>
    tpu.vector_store %arg7[%c0_30, %c0_31, %c0_32], %69 {strides = array<i32>} : memref<1x1x16xf32, #tpu.memory_space<vmem>>, vector<1x1x16xf32>,
    return
  }
  func.func @transform_0(%arg0: i32, %arg1: i32) -> (i32, i32, i32) {
    %c0_i32 = arith.constant 0 : i32
    %c0_i32_0 = arith.constant 0 : i32
    %c0_i32_1 = arith.constant 0 : i32
    return %arg0, %c0_i32, %c0_i32_0 : i32, i32, i32
  }
  func.func @transform_1(%arg0: i32, %arg1: i32) -> (i32, i32, i32) {
    %c0_i32 = arith.constant 0 : i32
    %c0_i32_0 = arith.constant 0 : i32
    %c0_i32_1 = arith.constant 0 : i32
    return %arg0, %c0_i32, %c0_i32_0 : i32, i32, i32
  }
  func.func @transform_2(%arg0: i32, %arg1: i32) -> (i32, i32, i32) {
    %c0_i32 = arith.constant 0 : i32
    %c0_i32_0 = arith.constant 0 : i32
    return %arg0, %arg1, %c0_i32 : i32, i32, i32
  }
  func.func @transform_3(%arg0: i32, %arg1: i32) -> (i32, i32, i32) {
    %c0_i32 = arith.constant 0 : i32
    %c0_i32_0 = arith.constant 0 : i32
    %c0_i32_1 = arith.constant 0 : i32
    return %arg0, %c0_i32, %c0_i32_0 : i32, i32, i32
  }
  func.func @transform_4(%arg0: i32, %arg1: i32) -> (i32, i32, i32) {
    %c0_i32 = arith.constant 0 : i32
    %c0_i32_0 = arith.constant 0 : i32
    %c0_i32_1 = arith.constant 0 : i32
    return %arg0, %c0_i32, %c0_i32_0 : i32, i32, i32
  }
  func.func @transform_5(%arg0: i32, %arg1: i32) -> (i32, i32, i32) {
    %c0_i32 = arith.constant 0 : i32
    %c0_i32_0 = arith.constant 0 : i32
    %c0_i32_1 = arith.constant 0 : i32
    return %arg0, %c0_i32, %c0_i32_0 : i32, i32, i32
  }
}

</mosaic_0001>

<bundles_post_ra>
// kernel: tpu_custom_call.1
= control target key start
LH: loop header
LB: loop body
LE: loop exit
PB: predicated region body
PF: predicated region fallthrough
CT: control target
= control target key end

     0   :  { %s1367_s0 = inlined_call_operand.vmem [shape: f32[2,16,4], index: 0, kind: input, shape index: {}]   ;;  %s1368_s1 = inlined_call_operand.vmem [shape: f32[2,4,16], index: 1, kind: input, shape index: {}]   ;;  %s1369_s2 = inlined_call_operand.vmem [shape: f32[2,16,16], index: 2, kind: input, shape index: {}]   ;;  %s1370_s3 = inlined_call_operand.hbm [shape: f32[2,4,4], index: 3, kind: output, shape index: {0}]   ;;  %s1371_s4 = inlined_call_operand.hbm [shape: f32[2,1,16], index: 4, kind: output, shape index: {1}]   ;;  %s1372_s5 = inlined_call_operand.hbm [shape: f32[2,1,16], index: 5, kind: output, shape index: {2}]  }
   0x1   :  { %1375 = sst [smem:[#allocation9_spill]] %s1367_s0 }
   0x2   :  { %11 = vsyncpa [#allocation3], 0 }
   0x3   :  { %13 = vsyncpa [#allocation3 + $0x1], 0 }
   0x4   :  { %14 = vsyncpa [#allocation5], 0 }
   0x5   :  { %16 = vsyncpa [#allocation5 + $0x1], 0  ;;  %s1128_s18 = smov 0   ;;  %s1130_s19 = smov 0  }
   0x6   :  { %s1132_s20 = smov 0   ;;  %s1134_s21 = smov 0  }
   0x7   :  { %s1136_s22 = smov 0   ;;  %s1138_s23 = smov 0  }
   0x8 LB: > { %s818_s24 = sadd.s32 4294967295, %s1086_s23   ;;  %s1373_s25 = sadd.s32 4294967294, %s1086_s23   ;;  %s1086_s23 = sphi %s1138_s23, %s22_s23   ;;  %s1082_s22 = sphi %s1136_s22, %s1385_s22   ;;  %s1078_s21 = sphi %s1134_s21, %s1384_s21   ;;  %s1074_s20 = sphi %s1132_s20, %s1383_s20   ;;  %s1070_s19 = sphi %s1130_s19, %s1382_s19   ;;  %s1066_s18 = sphi %s1128_s18, %s1381_s18  }
   0x9   : > { %s34_s26 = sadd.s32 1, %s1082_s22  ;;  %s121_s27 = sadd.s32 1, %s1074_s20 }
   0xa   : > { %p36_p0 = scmp.ge.s32.totalorder %s34_s26, 2  ;;  %p131_p1 = scmp.ne.s32.totalorder %s1074_s20, %s1070_s19 }
   0xb   : > { %p132_p2 = scmp.eq.s32.totalorder %s818_s24, 1  ;;  %p137_p3 = scmp.ne.s32.totalorder %s1070_s19, %s1066_s18 }
   0xc   : > { %s1387_s26 = smov (%p36_p0, %s34_s26), 0  ;;  %p138_p5 = scmp.eq.s32.totalorder %s1373_s25, 1 }
   0xd   : > { %p1170_p4 = por %p132_p2, %p131_p1  ;;  %s118_s29 = ssub.s32 %s1082_s22, %s1387_s26 }
   0xe   : > { %p822_p6 = scmp.ge.s32.totalorder %s1086_s23, 1  ;;  %p119_p7 = scmp.eq.s32.totalorder %s118_s29, 0 }
   0xf   : > { %p1179_p8 = por %p138_p5, %p137_p3  ;;  %p236_p9 = scmp.lt.s32.totalorder %s1086_s23, 3 }
  0x10   : > { %s1185_s6 = scalar_select %p119_p7, %s1074_s20, %s121_s27  }
  0x11   : > { %p237_p10 = pnand %p822_p6, %p236_p9 }
  0x12   : > { %p285_p11 = scmp.lt.s32.totalorder (!%p237_p10), %s1078_s21, 1  ;;  %vm321_vm0 = vcmask (!%p237_p10), 130048   ;;  %s1378_s0 = sld [smem:[#allocation9_spill]] (!%p237_p10)  ;;  %v1088_v5 = vmov (!%p237_p10), 0.0|0.0   ;;  %vm1089_vm1 = vmmov (!%p237_p10), 0   ;;  %v1090_v6 = vmov (!%p237_p10), 0.0  }
  0x13   : > { %240 = sbr.rel (%p237_p10) target bundleno = 483 (0x1e3), region = 32  ;;  %867 = vmatprep.subr.bf16.mxu1 (!%p237_p10), %v1088_v5  ;;  %860 = vmatprep.mubr.msk.f32.mxu1 (!%p237_p10), %vm1089_vm1, %v1090_v6  ;;  %v1091_v7 = vmov (!%p237_p10), 0   ;;  %v1092_v8 = vmov (!%p237_p10), 1   ;;  %v1093_v9 = vmov (!%p237_p10), 3   ;;  %v1094_v10 = vmov (!%p237_p10), 2   ;;  %s1208_s15 = sand.u32 (!%p237_p10), 1, %s1070_s19  }
  0x14   : > { %942 = vset.pattern.permute.xlu1 (!%p237_p10), %v1091_v7  ;;  %vm308_vm2 = vcmask (!%p237_p10), 27648   ;;  %s823_s16 = sshll.u32 (!%p237_p10), %s1208_s15, 2  ;;  %v523_v14 = vlaneseq (!%p237_p10)  ;;  %vm310_vm3 = vcmask (!%p237_p10), 122880   ;;  %s1241_s10 = scalar_lea.vmem (!%p237_p10), [#allocation6], %s1208_s15 }
  0x15   : > { %s1211_s17 = scalar_lea.vmem (!%p237_p10), [#allocation2], %s823_s16  ;;  %312 = vst.msk [vmem:[%s1241_s10] sm:$0x1] (!%p237_p10), %vm310_vm3, %v1090_v6  ;;  %s1374_s12 = sshll.u32 (!%p237_p10), %s1078_s21, 4 }
  0x16   : > { %309 = vst.msk [vmem:[%s1211_s17] sm:$0xf] (!%p237_p10), %vm308_vm2, %v1090_v6  ;;  %v524_v16 = vshrl.u32 (!%p237_p10), %v523_v14, 7  ;;  %s1257_s16 = scalar_lea.hbm (!%p237_p10), %s1371_s4, %s1374_s12 }
  0x18   : > { %v525_v18 = vsub.s32 (!%p237_p10), 0, %v524_v16  ;;  %v541_v19 = vsub.s32 (!%p237_p10), 1, %v524_v16  ;;  %v559_v24 = vsub.s32 (!%p237_p10), 2, %v524_v16  ;;  %v577_v32 = vsub.s32 (!%p237_p10), 3, %v524_v16 }
  0x1a   : > { %s1189_s7 = scalar_select %p285_p11, %s1078_s21, 1 }
  0x1c   : > { %s840_s8 = sshll.u32 %s1189_s7, 4  ;;  %s826_s27 = sshll.u32 %s1189_s7, 2 }
  0x1d   : > { %s289_s11 = scalar_lea.vmem %s1378_s0, %s840_s8  ;;  %s302_s14 = scalar_lea.vmem %s1369_s2, %s840_s8 }
  0x1e   : > { %v315_v0 = vld [vmem:[%s289_s11] sm:$0xff]  ;;  %v316_v1 = vld [vmem:[%s289_s11 + $0x8] sm:$0xff]  ;;  %s293_s9 = scalar_lea.vmem %s1368_s1, %s826_s27  ;;  %s1226_s7 = scalar_lea.vmem [#allocation4], %s1208_s15 }
  0x1f   : > { %v1198_v2 = vld [vmem:[%s302_s14] sm:$0xff]  ;;  %v863_v3 = vpack.c.bf16 %v316_v1, %v315_v0  ;;  %404 = vxpose.xlu0.b32.start [1/2] (short) (narrow) %v315_v0, 8  ;;  %v1202_v4 = vld [vmem:[%s302_s14 + $0x8] sm:$0xff]  ;;  %515 = vperm.xlu1 %942, %v315_v0   ;;  %311 = vst.msk [vmem:[%s1226_s7] sm:$0x1] %vm310_vm3, %v1090_v6  ;;  %s1249_s11 = sand.u32 1, %s818_s24  }
  0x20   : > { %853 = vmatprep.mubr.msk.f32.mxu0 %vm321_vm0, %v1198_v2  ;;  %v512_v20 = vld [vmem:[%s293_s9] sm:$0xf]  ;;  %vm601_vm4 = vcmp.ne.f32.partialorder %v1198_v2, 0.0  ;;  %vm602_vm5 = vcmp.ne.f32.partialorder %v1202_v4, 0.0  ;;  %s653_s27 = sshll.u32 %s1226_s7, 4  ;;  %s624_s29 = scalar_lea.sflag [#allocation5], %s1249_s11  ;;  %s654_s27 = int_to_ptr.vmem [resolvable:$true] %s653_s27 }
  0x21   : > { %864 = vmatprep.subr.bf16.mxu0 %v863_v3  ;;  %v526_v22 = vrot.slane %v512_v20, %v525_v18  ;;  %v542_v23 = vrot.slane %v512_v20, %v541_v19  ;;  %v560_v29 = vrot.slane %v512_v20, %v559_v24  ;;  %v578_v38 = vrot.slane %v512_v20, %v577_v32  ;;  %s948_s8 = scalar_lea.vmem %s654_s27, 16  ;;  %s1095_s24 = smov [#allocation4]  }
  0x22   : > { %866 = vmatpush3.bf16.msra.mxu0 %v863_v3  ;;  %v832_v3 = vsel %vm601_vm4, 1.0, %v1090_v6  ;;  %v833_v5 = vsel %vm602_vm5, 1.0, %v1090_v6  ;;  %p949_p12 = scmp.ne.s32.totalorder %s654_s27, %s948_s8  ;;  %s952_s9 = sshll.u32 %s1095_s24, 4  ;;  %s953_s9 = int_to_ptr.vmem [resolvable:$false] %s952_s9 }
  0x23   : > { %405 = vxpose.xlu0.b32.end [2/2] (short) (narrow) %v316_v1, 8  ;;  %520 = vperm.xlu1 %942, %v316_v1   ;;  %s954_s25 = scalar_lea.vmem %s953_s9, 32  ;;  %p955_p1 = scmp.lt.s32.totalorder %s654_s27, %s953_s9 }
  0x24   : > { %p950_p13 = pnand %p949_p12, %p1170_p4  ;;  %p956_p2 = scmp.lt.s32.totalorder %s954_s25, %s948_s8 }
  0x25   : > { %854 = vmatmul.mubr.msk.f32.vlgmr.msra.gmra.mrb[0].mxu0 %vm321_vm0, %v1202_v4 }
  0x26   : > { %p951_p0 = pneg %p950_p13  ;;  %p957_p3 = por %p956_p2, %p955_p1 }
  0x27   : > { %944 = vset.pattern.permute.xlu1 %v1092_v8 }
  0x28   : > { %536 = vperm.xlu1 %944, %v316_v1   ;;  %p958_p5 = pnand %p957_p3, %p951_p0 }
  0x2c   : > { %945 = vset.pattern.permute.xlu1 %v1094_v10  ;;  %v585_v10 = vld [vmem:[%s1226_s7] sm:$0x1] }
  0x2d   : > { %550 = vperm.xlu1 %945, %v315_v0  }
  0x31   : > { %554 = vperm.xlu1 %945, %v316_v1  }
  0x35   : > { %946 = vset.pattern.permute.xlu1 %v1093_v9 }
  0x36   : > { %568 = vperm.xlu1 %946, %v315_v0  }
  0x3a   : > { %572 = vperm.xlu1 %946, %v316_v1  }
  0x4c   : > { %943 = vset.pattern.permute.xlu0 %v1092_v8  ;;  %v607_v8 = vsel %vm321_vm0, %v832_v3, 0.0 }
  0x4d   : > { %532 = vperm.xlu0 %943, %v315_v0  }
  0x51   : > { %947 = vset.pattern.permute.xlu0 %v1093_v9  ;;  %v608_v9 = vsel %vm321_vm0, %v833_v5, 0.0 }
  0x9e   : > { %v516_v17 = vpop.permute.xlu1 %515 }
  0x9f   : > { %v420_v15 = vpop.trf.xlu0  ;;  %v527_v27 = vsub.f32 %v516_v17, %v526_v22  ;;  %v600_v17 = vld [vmem:[%s1241_s10] sm:$0x1] }
  0xa1   : > { %v529_v31 = vand.u32 2147483647, %v527_v27 }
  0xa2   : > { %v521_v21 = vpop.permute.xlu1 %520 }
  0xa3   : > { %v528_v34 = vsub.f32 %v521_v21, %v526_v22 }
  0xa5   : > { %v530_v40 = vand.u32 2147483647, %v528_v34 }
  0xa7   : > { %v537_v26 = vpop.permute.xlu1 %536 }
  0xa8   : > { %v544_v35 = vsub.f32 %v537_v26, %v542_v23 }
  0xaa   : > { %v546_v41 = vand.u32 2147483647, %v544_v35 }
  0xac   : > { %v551_v30 = vpop.permute.xlu1 %550  ;;  %v548_v45 = vadd.f32 %v546_v41, %v530_v40 }
  0xad   : > { %v561_v36 = vsub.f32 %v551_v30, %v560_v29 }
  0xaf   : > { %v563_v42 = vand.u32 2147483647, %v561_v36 }
  0xb0   : > { %v555_v37 = vpop.permute.xlu1 %554 }
  0xb1   : > { %v562_v43 = vsub.f32 %v555_v37, %v560_v29 }
  0xb3   : > { %v564_v46 = vand.u32 2147483647, %v562_v43 }
  0xb5   : > { %v569_v44 = vpop.permute.xlu1 %568  ;;  %v566_v51 = vadd.f32 %v564_v46, %v548_v45 }
  0xb6   : > { %v579_v47 = vsub.f32 %v569_v44, %v578_v38 }
  0xb8   : > { %v581_v49 = vand.u32 2147483647, %v579_v47 }
  0xb9   : > { %v573_v50 = vpop.permute.xlu1 %572 }
  0xba   : > { %v580_v53 = vsub.f32 %v573_v50, %v578_v38 }
  0xbc   : > { %v582_v55 = vand.u32 2147483647, %v580_v53 }
  0xbe   : > { %v584_v56 = vadd.f32 %v582_v55, %v566_v51 }
  0xc0   : > { %v587_v57 = vmul.f32 %v584_v56, %v1202_v4 }
  0xc2   : > { %v589_v59 = vsel %vm321_vm0, %v587_v57, 0.0 }
  0xcc   : > { %v533_v25 = vpop.permute.xlu0 %532 }
  0xcd   : > { %v543_v28 = vsub.f32 %v533_v25, %v542_v23 }
  0xcf   : > { %v545_v33 = vand.u32 2147483647, %v543_v28 }
  0xd1   : > { %v547_v39 = vadd.f32 %v545_v33, %v529_v31 }
  0xd3   : > { %v565_v48 = vadd.f32 %v563_v42, %v547_v39 }
  0xd5   : > { %v583_v52 = vadd.f32 %v581_v49, %v565_v48 }
  0xd7   : > { %v586_v54 = vmul.f32 %v583_v52, %v1198_v2  ;;  %v609_v2 = vadd.f32 %v608_v9, %v607_v8 }
  0xd9   : > { %v588_v58 = vsel %vm321_vm0, %v586_v54, 0.0  ;;  %v610_v4 = vrot.slane %v609_v2, 4 }
  0xda   : > { %v590_v60 = vadd.f32 %v589_v59, %v588_v58 }
  0xdc   : > { %v591_v61 = vrot.slane %v590_v60, 4 }
  0xde   : > { %v592_v62 = vadd.f32 %v591_v61, %v590_v60 }
  0xe0   : > { %v593_v63 = vrot.slane %v592_v62, 2 }
  0xe2   : > { %v594_v0 = vadd.f32 %v593_v63, %v592_v62 }
  0xe4   : > { %v595_v1 = vrot.slane %v594_v0, 1 }
  0xe6   : > { %v596_v7 = vadd.f32 %v595_v1, %v594_v0 }
  0xf8   : > { %v855_v11 = vpop.f32.mrb[0].mxu0 }
  0xf9   : > { %v394_v12 = vpop.f32.mrb[1].mxu0 }
  0xfa   : > { %v868_v13 = vpack.c.bf16 %v855_v11, %v394_v12  ;;  %v597_v11 = vadd.f32 %v596_v7, %v585_v10  ;;  %v611_v12 = vadd.f32 %v610_v4, %v609_v2 }
  0xfc   : > { %869 = vmatpush3.bf16.msra.mxu1 %v868_v13  ;;  %599 = vst.msk [vmem:[%s1226_s7] sm:$0x1] %vm310_vm3, %v597_v11  ;;  %v612_v13 = vrot.slane %v611_v12, 2 }
  0xfe   : > { %v613_v14 = vadd.f32 %v612_v13, %v611_v12 }
  0xff   : > { %861 = vmatmul.mubr.msk.f32.vlgmr.msra.gmra.mrb[0].mxu1 %vm321_vm0, %v420_v15 }
 0x100   : > { %v614_v15 = vrot.slane %v613_v14, 1 }
 0x102   : > { %v615_v16 = vadd.f32 %v614_v15, %v613_v14 }
 0x104   : > { %v616_v18 = vadd.f32 %v615_v16, %v600_v17 }
 0x106   : > { %617 = vst.msk [vmem:[%s1241_s10] sm:$0x1] %vm310_vm3, %v616_v18 }
 0x107   : > { %961 = shalt.err (!%p958_p5)
}
 0x108   : > { %s962_s7 = scalar_lea.hbm %s1257_s16, 16  ;;  %s966_s24 = scalar_lea.hbm %s1371_s4, 32 }
 0x109   : > { %p963_p6 = scmp.ne.s32.totalorder %s1257_s16, %s962_s7  ;;  %p967_p10 = scmp.lt.u32.totalorder %s1257_s16, %s1371_s4 }
 0x10a   : > { %p968_p11 = scmp.lt.u32.totalorder %s966_s24, %s962_s7  ;;  %p970_p13 = scmp.lt.u32.totalorder %s962_s7, %s1257_s16 }
 0x10b   : > { %p964_p7 = pnand %p963_p6, %p1170_p4 }
 0x10c   : > { %p969_p12 = por %p968_p11, %p967_p10 }
 0x10d   : > { %p965_p9 = pneg %p964_p7 }
 0x10e   : > { %p971_p0 = por %p970_p13, %p969_p12 }
 0x110   : > { %p972_p1 = pnand %p971_p0, %p965_p9 }
 0x112   : > { %975 = shalt.err (!%p972_p1)
}
 0x113   : > { %871 = dma.vmem_to_hbm [thread:$0]  (%p1170_p4), %s654_s27, 16, %s1257_s16, %s624_s29  }
 0x114   : > { %s1379_s25 = sshll.u32 %s1078_s21, 4  ;;  %s666_s14 = sshll.u32 %s1241_s10, 4  ;;  %s667_s14 = int_to_ptr.vmem [resolvable:$true] %s666_s14 }
 0x115   : > { %s1287_s12 = scalar_lea.hbm %s1372_s5, %s1379_s25  ;;  %s976_s7 = scalar_lea.vmem %s667_s14, 16 }
 0x116   : > { %p977_p2 = scmp.ne.s32.totalorder %s667_s14, %s976_s7  ;;  %s1096_s24 = smov [#allocation6]  }
 0x117   : > { %s980_s9 = sshll.u32 %s1096_s24, 4  ;;  %s981_s9 = int_to_ptr.vmem [resolvable:$false] %s980_s9 }
 0x118   : > { %p978_p3 = pnand %p977_p2, %p1170_p4  ;;  %s982_s0 = scalar_lea.vmem %s981_s9, 32 }
 0x119   : > { %p983_p6 = scmp.lt.s32.totalorder %s667_s14, %s981_s9  ;;  %p984_p7 = scmp.lt.s32.totalorder %s982_s0, %s976_s7 }
 0x11a   : > { %p979_p5 = pneg %p978_p3 }
 0x11b   : > { %p985_p9 = por %p984_p7, %p983_p6 }
 0x11d   : > { %p986_p10 = pnand %p985_p9, %p979_p5 }
 0x11f   : > { %989 = shalt.err (!%p986_p10)
}
 0x120   : > { %s990_s10 = scalar_lea.hbm %s1287_s12, 16  ;;  %s994_s25 = scalar_lea.hbm %s1372_s5, 32 }
 0x121   : > { %p991_p11 = scmp.ne.s32.totalorder %s1287_s12, %s990_s10  ;;  %p995_p0 = scmp.lt.u32.totalorder %s1287_s12, %s1372_s5 }
 0x122   : > { %p996_p1 = scmp.lt.u32.totalorder %s994_s25, %s990_s10  ;;  %p998_p3 = scmp.lt.u32.totalorder %s990_s10, %s1287_s12 }
 0x123   : > { %p992_p12 = pnand %p991_p11, %p1170_p4 }
 0x124   : > { %p997_p2 = por %p996_p1, %p995_p0 }
 0x125   : > { %p993_p13 = pneg %p992_p12 }
 0x126   : > { %p999_p5 = por %p998_p3, %p997_p2 }
 0x128   : > { %p1000_p6 = pnand %p999_p5, %p993_p13 }
 0x12a   : > { %1003 = shalt.err (!%p1000_p6)
}
 0x12b   : > { %872 = dma.vmem_to_hbm [thread:$0]  (%p1170_p4), %s667_s14, 16, %s1287_s12, %s624_s29   ;;  %v403_v6 = vld [vmem:[%s1211_s17] sm:$0xf] }
 0x12c   : > { %s835_s0 = sshll.u32 %s1078_s21, 6  ;;  %s640_s7 = sshll.u32 %s1211_s17, 4  ;;  %s1317_s7 = int_to_ptr.vmem [resolvable:$true] %s640_s7 }
 0x12d   : > { %s1315_s10 = scalar_lea.hbm %s1370_s3, %s835_s0  ;;  %s619_s11 = scalar_lea.sflag [#allocation3], %s1208_s15 }
 0x12e   : > { %s1004_s29 = scalar_lea.vmem %s1317_s7, 64  ;;  %s1097_s21 = smov [#allocation2]  }
 0x12f   : > { %p1005_p7 = scmp.ne.s32.totalorder %s1317_s7, %s1004_s29  ;;  %s1008_s12 = sshll.u32 %s1097_s21, 4  ;;  %s1009_s12 = int_to_ptr.vmem [resolvable:$false] %s1008_s12 }
 0x130   : > { %s1010_s14 = scalar_lea.vmem %s1009_s12, 128  ;;  %p1011_p11 = scmp.lt.s32.totalorder %s1317_s7, %s1009_s12 }
 0x131   : > { %p1006_p9 = pnand %p1005_p7, %p1170_p4  ;;  %p1012_p12 = scmp.lt.s32.totalorder %s1010_s14, %s1004_s29 }
 0x133   : > { %p1007_p10 = pneg %p1006_p9  ;;  %p1013_p13 = por %p1012_p12, %p1011_p11 }
 0x135   : > { %p1014_p0 = pnand %p1013_p13, %p1007_p10 }
 0x1d2   : > { %v505_v19 = vpop.f32.mrb[0].mxu1 }
 0x1d3   : > { %v509_v20 = vadd.f32 %v505_v19, %v403_v6  ;;  %v862_v21 = vpop.f32.mrb[1].mxu1 }
 0x1d5   : > { %511 = vst.msk [vmem:[%s1211_s17] sm:$0xf] %vm308_vm2, %v509_v20 }
 0x1d6   : > { %1017 = shalt.err (!%p1014_p0)
}
 0x1d7   : > { %s1018_s15 = scalar_lea.hbm %s1315_s10, 64  ;;  %s1022_s27 = scalar_lea.hbm %s1370_s3, 128 }
 0x1d8   : > { %p1019_p1 = scmp.ne.s32.totalorder %s1315_s10, %s1018_s15  ;;  %p1023_p5 = scmp.lt.u32.totalorder %s1315_s10, %s1370_s3 }
 0x1d9   : > { %p1024_p6 = scmp.lt.u32.totalorder %s1022_s27, %s1018_s15  ;;  %p1026_p9 = scmp.lt.u32.totalorder %s1018_s15, %s1315_s10 }
 0x1da   : > { %p1020_p2 = pnand %p1019_p1, %p1170_p4 }
 0x1db   : > { %p1025_p7 = por %p1024_p6, %p1023_p5 }
 0x1dc   : > { %p1021_p3 = pneg %p1020_p2 }
 0x1dd   : > { %p1027_p10 = por %p1026_p9, %p1025_p7 }
 0x1df   : > { %p1028_p11 = pnand %p1027_p10, %p1021_p3 }
 0x1e1   : > { %1031 = shalt.err (!%p1028_p11)
}
 0x1e2   : > { %870 = dma.vmem_to_hbm [thread:$0]  (%p1170_p4), %s1317_s7, 64, %s1315_s10, %s619_s11  }
 0x1e3 PF: > { %p886_p12 = scmp.ge.s32.totalorder %s1086_s23, 2  ;;  %s678_s13 = sand.u32 1, %s1066_s18  }
 0x1e4   : > { %s679_s0 = scalar_lea.sflag [#allocation3], %s678_s13 }
 0x1e5   : > { %p877_p13 = pnand %p886_p12, %p1179_p8 }
 0x1e7   : > { %1057 = dma.done.wait (!%p877_p13), %s679_s0, 64  }
 0x1e8   : > { %1059 = vsyncadd (!%p877_p13), %s679_s0, 4294967232  ;;  %s1380_s24 = sadd.s32 4294967294, %s1086_s23  }
 0x1e9   : > { %s687_s9 = sand.u32 1, %s1380_s24  }
 0x1ea   : > { %s688_s29 = scalar_lea.sflag [#allocation5], %s687_s9 }
 0x1eb   : > { %1061 = dma.done.wait (!%p877_p13), %s688_s29, 32  }
 0x1ec   : > { %1063 = vsyncadd (!%p877_p13), %s688_s29, 4294967264  ;;  %s22_s23 = sadd.s32 1, %s1086_s23   ;;  %s1381_s18 = smov %s1070_s19 }
 0x1ed   : > { %p19_p4 = scmp.ge.s32.totalorder %s22_s23, 4   ;;  %s1382_s19 = smov %s1074_s20 }
 0x1ee   : > { %s1383_s20 = smov %s1185_s6  ;;  %s1384_s21 = smov %s1082_s22 }
 0x1ef   : > { %s1385_s22 = smov %s1387_s26  ;;  %21 = sbr.rel (!%p19_p4) target bundleno = 8 (0x8), region = 110 }
 0x1f6   :  { %700 = vsyncpa [#allocation3], 1 }
 0x1f7   :  { %702 = vsyncpa [#allocation3 + $0x1], 1 }
 0x1f8   :  { %703 = vsyncpa [#allocation5], 1 }
 0x1f9   :  { %705 = vsyncpa [#allocation5 + $0x1], 1 }

</bundles_post_ra>
